<compile_context>
chip_gen: v5e
topology: v5e:2x2
jax: 0.10.0
libtpu: 0.0.40
codegen_flags: <defaults>
</compile_context>

<pallas_src>
import jax
import jax.numpy as jnp
from jax.experimental import pallas as pl
from jax.experimental.pallas import tpu as pltpu

_LANE = 128
_TARGET_TILE_BYTES = 4 * 1024 * 1024      # ~4 MiB per block: roofline on all gens
_SINGLE_BLOCK_MAX_ROWS = 256              # tiny tensors: one full-extent block
_VMEM_LIMIT_BYTES = 32 * 1024 * 1024      # covers 2x(in)+2x(out) 4 MiB tiles on v5e,
                                          # == default on v6e/v7x (<= 64 MiB physical)


def _round_up(x: int, m: int) -> int:
    return ((x + m - 1) // m) * m


def _choose_block_rows(rows: int, itemsize: int) -> int:
    """Pick a row-block size: ~4 MiB tiles, >=2 blocks for non-trivial inputs."""
    if rows <= _SINGLE_BLOCK_MAX_ROWS:
        # Single full-extent block (always a legal block shape); per-step
        # overhead dominates at this size anyway.
        return rows
    # Dtype-aware target so tile bytes stay ~4 MiB (8192 rows f32, 16384 bf16).
    target = max(32, (_TARGET_TILE_BYTES // (_LANE * itemsize)) // 32 * 32)
    # At least 2 blocks so the v7x megacore has something to shard across its
    # two TensorCores; keep it a multiple of 32 for sublane packing / legal
    # partial edge blocks.
    half = _round_up(pl.cdiv(rows, 2), 32)
    return min(target, half)


def _rezero_kernel(g_ref, x_ref, o_ref):
    # g_ref: (1, 1) f32 gate in SMEM; x_ref / o_ref: (block_rows, 128) VMEM tiles.
    # Multiply in the tile's native dtype (bf16-native VPU on v6e/v7x; the
    # compiler widens automatically on v5e). Output dtype == input dtype.
    g = g_ref[0, 0].astype(o_ref.dtype)
    o_ref[...] = x_ref[...] * g


def rezero_forward(x: jax.Array, g: jax.Array, *, donate_x: bool = False) -> jax.Array:
    """y = x * g  (g is a scalar parameter of shape (1,))."""
    orig_shape = x.shape
    orig_dtype = x.dtype
    n = x.size
    itemsize = jnp.dtype(orig_dtype).itemsize

    g_f32 = jnp.reshape(g.astype(jnp.float32), (1, 1))

    rows = n // _LANE
    rem = n - rows * _LANE

    # Fewer than 128 elements (or empty): a kernel launch is pure overhead.
    if rows == 0:
        return (x.astype(jnp.float32) * g_f32[0, 0]).astype(orig_dtype)

    x_flat = jnp.reshape(x, (-1,))          # zero-copy view of a contiguous array
    main = rows * _LANE
    x_main = x_flat if rem == 0 else x_flat[:main]
    x2d = jnp.reshape(x_main, (rows, _LANE))

    block_rows = _choose_block_rows(rows, itemsize)
    grid = (pl.cdiv(rows, block_rows),)

    # Only alias x -> y when the caller explicitly donates x; otherwise XLA
    # would insert a defensive copy, adding HBM traffic instead of saving it.
    io_aliases = {1: 0} if (donate_x and rem == 0) else {}

    y2d = pl.pallas_call(
        _rezero_kernel,
        out_shape=jax.ShapeDtypeStruct((rows, _LANE), orig_dtype),
        grid_spec=pltpu.PrefetchScalarGridSpec(
            num_scalar_prefetch=0,
            grid=grid,
            in_specs=[
                pl.BlockSpec(memory_space=pltpu.SMEM),                # g (scalar)
                pl.BlockSpec((block_rows, _LANE), lambda i: (i, 0)),  # x tile
            ],
            out_specs=pl.BlockSpec((block_rows, _LANE), lambda i: (i, 0)),
        ),
        compiler_params=pltpu.CompilerParams(
            dimension_semantics=("parallel",),   # lets the v7x megacore split rows
            vmem_limit_bytes=_VMEM_LIMIT_BYTES,
        ),
        cost_estimate=pl.CostEstimate(
            flops=rows * _LANE,
            transcendentals=0,
            bytes_accessed=2 * rows * _LANE * itemsize,
        ),
        input_output_aliases=io_aliases,
    )(g_f32, x2d)

    if rem:
        # <128-element tail: plain XLA multiply, appended to the kernel output.
        y_tail = (x_flat[main:].astype(jnp.float32) * g_f32[0, 0]).astype(orig_dtype)
        y_flat = jnp.concatenate([jnp.reshape(y2d, (-1,)), y_tail])
        return jnp.reshape(y_flat, orig_shape)
    return jnp.reshape(y2d, orig_shape)


if __name__ == "__main__":
    key = jax.random.PRNGKey(0)

    # NCHW input, matching the PyTorch convention.
    x = jax.random.normal(key, (2, 4, 16, 16), dtype=jnp.float32)

    # Parameter init exactly as in the module: g = zeros(1).
    g = jnp.zeros((1,), dtype=jnp.float32)
    y = rezero_forward(x, g)
    jax.block_until_ready(y)
    assert y.shape == x.shape and y.dtype == x.dtype
    assert jnp.allclose(y, x * g[0])

    # Nonzero gate.
    g2 = jnp.array([0.5], dtype=jnp.float32)
    y2 = rezero_forward(x, g2)
    jax.block_until_ready(y2)
    assert jnp.allclose(y2, x * 0.5, atol=1e-6)

    # Multi-block path (rows > 256 -> >=2 blocks for megacore sharding).
    x_big = jax.random.normal(jax.random.PRNGKey(2), (8, 8, 32, 32), dtype=jnp.float32)
    y_big = rezero_forward(x_big, g2)
    jax.block_until_ready(y_big)
    assert jnp.allclose(y_big, x_big * 0.5, atol=1e-6)

    # bf16 path (native-dtype multiply).
    x_bf = jax.random.normal(jax.random.PRNGKey(3), (4, 8, 32, 32)).astype(jnp.bfloat16)
    y_bf = rezero_forward(x_bf, g2)
    jax.block_until_ready(y_bf)
    assert y_bf.dtype == jnp.bfloat16
    assert jnp.allclose(y_bf.astype(jnp.float32), x_bf.astype(jnp.float32) * 0.5, atol=1e-2)

    # Ragged sizes: tiny (<128 elems, XLA fallback) and prefix+tail (rows>0, rem>0).
    x3 = jax.random.normal(jax.random.PRNGKey(1), (3, 5, 7), dtype=jnp.float32)
    y3 = rezero_forward(x3, g2)
    jax.block_until_ready(y3)
    assert jnp.allclose(y3, x3 * 0.5, atol=1e-6)

    x4 = jax.random.normal(jax.random.PRNGKey(4), (647,), dtype=jnp.float32)
    y4 = rezero_forward(x4, g2)
    jax.block_until_ready(y4)
    assert jnp.allclose(y4, x4 * 0.5, atol=1e-6)

    print("KERNEL_OK")
</pallas_src>

<mosaic_0001>
module attributes {stable_mosaic.version = 11 : i64} {
  func.func @_rezero_kernel(%arg0: i32, %arg1: memref<1x1xf32, #tpu.memory_space<smem>>, %arg2: memref<16x128xf32, #tpu.memory_space<vmem>>, %arg3: memref<16x128xf32, #tpu.memory_space<vmem>>) attributes {dimension_semantics = [#tpu.dimension_semantics<parallel>], iteration_bounds = array<i64: 1>, scalar_prefetch = 0 : i64, scratch_operands = 0 : i64, tpu.core_type = #tpu.core_type<tc>, window_params = [{transform_indices = @transform_0, window_bounds = array<i64: 1, 1>}, {transform_indices = @transform_1, window_bounds = array<i64: 16, 128>}, {transform_indices = @transform_2, window_bounds = array<i64: 16, 128>}]} {
    %c0 = arith.constant 0 : index
    %c0_0 = arith.constant 0 : index
    %0 = memref.load %arg1[%c0, %c0_0] : memref<1x1xf32, #tpu.memory_space<smem>>
    %c0_1 = arith.constant 0 : index
    %c0_2 = arith.constant 0 : index
    %1 = vector.load %arg2[%c0_1, %c0_2] : memref<16x128xf32, #tpu.memory_space<vmem>>, vector<16x128xf32>
    %2 = vector.broadcast %0 : f32 to vector<16x128xf32>
    %3 = arith.mulf %1, %2 : vector<16x128xf32>
    %c0_3 = arith.constant 0 : index
    %c0_4 = arith.constant 0 : index
    %4 = vector.load %arg3[%c0_3, %c0_4] : memref<16x128xf32, #tpu.memory_space<vmem>>, vector<16x128xf32>
    tpu.vector_store %arg3[%c0_3, %c0_4], %3 {strides = array<i32>} : memref<16x128xf32, #tpu.memory_space<vmem>>, vector<16x128xf32>,
    return
  }
  func.func @transform_0(%arg0: i32) -> (i32, i32) {
    %c0_i32 = arith.constant 0 : i32
    %c0_i32_0 = arith.constant 0 : i32
    %c0_i32_1 = arith.constant 0 : i32
    return %c0_i32, %c0_i32_0 : i32, i32
  }
  func.func @transform_1(%arg0: i32) -> (i32, i32) {
    %c0_i32 = arith.constant 0 : i32
    %c0_i32_0 = arith.constant 0 : i32
    return %arg0, %c0_i32 : i32, i32
  }
  func.func @transform_2(%arg0: i32) -> (i32, i32) {
    %c0_i32 = arith.constant 0 : i32
    %c0_i32_0 = arith.constant 0 : i32
    return %arg0, %c0_i32 : i32, i32
  }
}

</mosaic_0001>

<bundles_post_ra>
// kernel: tpu_custom_call.1
= control target key start
LH: loop header
LB: loop body
LE: loop exit
PB: predicated region body
PF: predicated region fallthrough
CT: control target
= control target key end

     0   :  { %8 = vsyncpa [#allocation4], 0  ;;  %s140_s0 = inlined_call_operand.<no memory space> [shape: f32[1,1], index: 0, kind: input, shape index: {}]   ;;  %s141_s1 = inlined_call_operand.hbm [shape: f32[16,128], index: 1, kind: input, shape index: {}]   ;;  %s142_s2 = inlined_call_operand.hbm [shape: f32[16,128], index: 2, kind: output, shape index: {}]  }
   0x1   :  { %9 = vsyncpa [#allocation5], 0  ;;  %s16_s11 = sshll.u32 %s141_s1, 4  ;;  %s112_s12 = smov [#allocation3]   ;;  %s17_s11 = int_to_ptr.hbm [resolvable:$true] %s16_s11 }
   0x2   :  { %s18_s13 = sshll.u32 %s112_s12, 4  ;;  %s113_s14 = smov 128   ;;  %s19_s13 = int_to_ptr.vmem [resolvable:$true] %s18_s13 }
   0x3   :  { %s114_s15 = smov 8  }
   0x4   :  { %24 = dma.hbm_to_vmem [thread:$0]  %s17_s11, 256, %s19_s13, [#allocation4], %s113_s14, %s113_s14, %s114_s15  }
   0x5   :  { %108 = dma.done.wait [#allocation4], 256  }
   0x6   :  { %109 = vsyncadd [#allocation4], 4294967040  ;;  %v32_v0 = vstv %s140_s0  ;;  %s115_s18 = smov [#allocation6]   ;;  %s43_s22 = sshll.u32 %s142_s2, 4  ;;  %v30_v1 = vld [vmem:[#allocation3] sm:$0xff]  ;;  %v31_v2 = vld [vmem:[#allocation3 + $0x8] sm:$0xff]  ;;  %s44_s22 = int_to_ptr.hbm [resolvable:$true] %s43_s22 }
   0x7   :  { %s41_s19 = sshll.u32 %s115_s18, 4  ;;  %v33_v3 = vmul.f32 %v32_v0, %v30_v1  ;;  %v34_v4 = vmul.f32 %v32_v0, %v31_v2  ;;  %s42_s19 = int_to_ptr.vmem [resolvable:$true] %s41_s19 }
   0x9   :  { %35 = vst [vmem:[#allocation6] sm:$0xff] %v33_v3 }
   0xa   :  { %36 = vst [vmem:[#allocation6 + $0x8] sm:$0xff] %v34_v4 }
   0xb   :  { %49 = dma.vmem_to_hbm [thread:$0]  %s42_s19, 256, %s44_s22, [#allocation5], %s113_s14, %s113_s14, %s114_s15  }
   0xc   :  { %110 = dma.done.wait [#allocation5], 256  }
   0xd   :  { %111 = vsyncadd [#allocation5], 4294967040 }
   0xe   :  { %54 = vsyncpa [#allocation4], 1 }
   0xf   :  { %55 = vsyncpa [#allocation5], 1 }

</bundles_post_ra>
